<compile_context>
chip_gen: v7x
topology: tpu7x:2x2x1
jax: 0.10.0
libtpu: 0.0.40
codegen_flags: <defaults>
</compile_context>

<pallas_src>
import math
import functools

import jax
import jax.numpy as jnp
from jax.experimental import pallas as pl
from jax.experimental.pallas import tpu as pltpu


# ---------------------------------------------------------------------------
# Helpers: generation-aware tile / VMEM budgeting
# ---------------------------------------------------------------------------
def _cdiv(a, b):
    return (a + b - 1) // b


def _round_up(x, m):
    return _cdiv(x, m) * m


def _hw_budget():
    """(time-tile cap, vmem_limit_bytes) from the local chip's VMEM size."""
    try:
        vmem_cap = pltpu.get_tpu_info().vmem_capacity_bytes
    except Exception:                       # unknown chip -> conservative budget
        vmem_cap = 64 * 1024 * 1024
    if vmem_cap >= 96 * 1024 * 1024:        # v5e / v6e: 128 MiB VMEM
        return 1024, 100 * 1024 * 1024
    return 512, 48 * 1024 * 1024            # v7x: 64 MiB VMEM


def _flash_tiles(t_t, t_s, batch, n_heads, dk, c_out, cap, vmem_limit):
    """Pick (tq, tk): 128-multiples, capped, VMEM-budgeted, 2-TC friendly."""
    tq = min(cap, _round_up(t_t, 128))
    tk = min(cap, _round_up(t_s, 128))
    # v7x shards the parallel grid axes over 2 TensorCores: keep >= 2 q-tiles
    # of work available when the batch alone doesn't provide it.
    if batch * _cdiv(t_t, tq) < 2:
        tq = max(128, min(tq, _round_up(_cdiv(t_t, 2), 128)))

    def est(tq_, tk_):
        return (2 * n_heads * tq_ * dk * 2          # q block (bf16, 2 bufs)
                + 2 * 2 * n_heads * tk_ * dk * 2    # kv block (bf16, 2 bufs)
                + 2 * n_heads * c_out * dk * 2      # fused out-proj weight
                + 2 * c_out * tq_ * 4               # output block (f32)
                + n_heads * tq_ * (dk + 2) * 4      # m / l / acc scratch
                + 2 * n_heads * tq_ * tk_ * 4)      # scores + probs (f32)

    while est(tq, tk) > 0.7 * vmem_limit:
        if tk >= tq and tk > 128:
            tk = max(128, _round_up(tk // 2, 128))
        elif tq > 128:
            tq = max(128, _round_up(tq // 2, 128))
        else:
            break
    return tq, tk


# ---------------------------------------------------------------------------
# Kernel 1: head-split pointwise (1x1) conv
#           (B, Tp, Cin) x (Hout, Cin, dk) -> (B, Hout, Tp, dk)  [bf16 out]
# ---------------------------------------------------------------------------
def _head_proj_kernel(x_ref, w_ref, b_ref, o_ref):
    # x_ref: (1, tT, Cin) bf16; w_ref: (1, Cin, dk) bf16; b_ref: (1, 1, dk) f32
    y = jnp.dot(x_ref[0], w_ref[0], preferred_element_type=jnp.float32)
    o_ref[0, 0] = (y + b_ref[0]).astype(o_ref.dtype)


def head_proj(x_btc, w_hio, b_h1o, t_tile, vmem_limit):
    B, Tp, Cin = x_btc.shape
    Hout, _, dk = w_hio.shape
    return pl.pallas_call(
        _head_proj_kernel,
        out_shape=jax.ShapeDtypeStruct((B, Hout, Tp, dk), jnp.bfloat16),
        grid=(B, Tp // t_tile, Hout),          # h innermost: x tile stays resident
        in_specs=[
            pl.BlockSpec((1, t_tile, Cin), lambda b, t, h: (b, t, 0)),
            pl.BlockSpec((1, Cin, dk), lambda b, t, h: (h, 0, 0)),
            pl.BlockSpec((1, 1, dk), lambda b, t, h: (h, 0, 0)),
        ],
        out_specs=pl.BlockSpec((1, 1, t_tile, dk), lambda b, t, h: (b, h, t, 0)),
        compiler_params=pltpu.CompilerParams(
            dimension_semantics=("parallel", "parallel", "parallel"),
            vmem_limit_bytes=vmem_limit),
    )(x_btc, w_hio, b_h1o)


# ---------------------------------------------------------------------------
# Kernel 2: flash attention (all heads batched) + fused output projection,
#           writing the (B, out_channels, T_t) NCT result directly.
# ---------------------------------------------------------------------------
def _flash_kernel(q_ref, kv_ref, wo_ref, bo_ref, o_ref, m_sc, l_sc, acc_sc,
                  *, n_heads, tk, ts_valid, kv_padded):
    ik = pl.program_id(2)

    @pl.when(ik == 0)
    def _init():
        m_sc[...] = jnp.full(m_sc.shape, -jnp.inf, jnp.float32)
        l_sc[...] = jnp.zeros(l_sc.shape, jnp.float32)
        acc_sc[...] = jnp.zeros(acc_sc.shape, jnp.float32)

    q = q_ref[0]                       # (H, tq, dk)  bf16, 1/sqrt(dk) folded in
    kv = kv_ref[0]                     # (2H, tk, dk) bf16
    k = kv[:n_heads]                   # leading-axis slice: free (no relayout)
    v = kv[n_heads:]

    # scores for all heads in one batched MXU call: (H, tq, tk) f32
    s = jax.lax.dot_general(q, k, (((2,), (2,)), ((0,), (0,))),
                            preferred_element_type=jnp.float32)
    if kv_padded:                      # static: only emitted when T_s was padded
        kpos = ik * tk + jax.lax.broadcasted_iota(jnp.int32, s.shape, 2)
        s = jnp.where(kpos < ts_valid, s, jnp.float32(-1e30))

    m_prev = m_sc[...]
    m_new = jnp.maximum(m_prev, jnp.max(s, axis=-1, keepdims=True))
    alpha = jnp.exp(m_prev - m_new)
    p = jnp.exp(s - m_new)
    l_sc[...] = alpha * l_sc[...] + jnp.sum(p, axis=-1, keepdims=True)
    acc_sc[...] = alpha * acc_sc[...] + jax.lax.dot_general(
        p.astype(v.dtype), v, (((2,), (1,)), ((0,), (0,))),
        preferred_element_type=jnp.float32)
    m_sc[...] = m_new

    @pl.when(ik == pl.num_programs(2) - 1)
    def _finalize():
        attn = acc_sc[...] * pl.reciprocal(l_sc[...], approx=True)    # (H, tq, dk)
        # fused output projection, written straight in NCT layout:
        # y[h, co, t] = sum_d wo[h, co, d] * attn[h, t, d]
        y = jax.lax.dot_general(wo_ref[...], attn.astype(wo_ref.dtype),
                                (((2,), (2,)), ((0,), (0,))),
                                preferred_element_type=jnp.float32)   # (H, Cout, tq)
        o_ref[0] = (jnp.sum(y, axis=0) + bo_ref[...]).astype(o_ref.dtype)


def flash_mha_outproj(q_bhtd, kv_bhtd, wo_hcd, bo_c1, *, ts_valid, tq, tk,
                      vmem_limit, out_dtype):
    B, H, Ttp, dk = q_bhtd.shape
    Tsp = kv_bhtd.shape[2]
    Cout = wo_hcd.shape[1]
    kern = functools.partial(_flash_kernel, n_heads=H, tk=tk, ts_valid=ts_valid,
                             kv_padded=(Tsp != ts_valid))
    return pl.pallas_call(
        kern,
        out_shape=jax.ShapeDtypeStruct((B, Cout, Ttp), out_dtype),
        grid=(B, Ttp // tq, Tsp // tk),
        in_specs=[
            pl.BlockSpec((1, H, tq, dk), lambda b, iq, ik: (b, 0, iq, 0)),
            pl.BlockSpec((1, 2 * H, tk, dk), lambda b, iq, ik: (b, 0, ik, 0)),
            pl.BlockSpec((H, Cout, dk), lambda b, iq, ik: (0, 0, 0)),
            pl.BlockSpec((Cout, 1), lambda b, iq, ik: (0, 0)),
        ],
        out_specs=pl.BlockSpec((1, Cout, tq), lambda b, iq, ik: (b, 0, iq)),
        scratch_shapes=[
            pltpu.VMEM((H, tq, 1), jnp.float32),    # running max
            pltpu.VMEM((H, tq, 1), jnp.float32),    # running denominator
            pltpu.VMEM((H, tq, dk), jnp.float32),   # output accumulator
        ],
        compiler_params=pltpu.CompilerParams(
            dimension_semantics=("parallel", "parallel", "arbitrary"),
            vmem_limit_bytes=vmem_limit),
    )(q_bhtd, kv_bhtd, wo_hcd, bo_c1)


# ---------------------------------------------------------------------------
# One-time parameter transforms (would live in module init in real use)
# ---------------------------------------------------------------------------
def prepare_params(params, n_heads):
    """Fold 1/sqrt(dk) into Wq, reshape to head-major (H, Cin, dk), fuse K|V
    along the head axis, reshape Wo to (H, Cout, dk), pre-cast weights bf16."""
    C = params["wq"].shape[0]
    dk = C // n_heads
    scale = 1.0 / math.sqrt(dk)

    def head_major(w):                 # (H*dk, Cin) -> (H, Cin, dk)
        return jnp.transpose(w.reshape(n_heads, dk, -1), (0, 2, 1))

    wq_h = head_major(params["wq"] * scale)
    wk_h = head_major(params["wk"])
    wv_h = head_major(params["wv"])
    c_out = params["wo"].shape[0]
    wo_h = jnp.transpose(params["wo"].reshape(c_out, n_heads, dk), (1, 0, 2))

    return {
        "wq_h": wq_h.astype(jnp.bfloat16),                                # (H, C, dk)
        "bq_h": (params["bq"] * scale).reshape(n_heads, 1, dk),           # (H, 1, dk)
        "wkv_h": jnp.concatenate([wk_h, wv_h], 0).astype(jnp.bfloat16),   # (2H, C, dk)
        "bkv_h": jnp.concatenate([params["bk"].reshape(n_heads, 1, dk),
                                  params["bv"].reshape(n_heads, 1, dk)], 0),
        "wo_h": wo_h.astype(jnp.bfloat16),                                # (H, Cout, dk)
        "bo": params["bo"].reshape(-1, 1).astype(jnp.float32),            # (Cout, 1)
    }


# ---------------------------------------------------------------------------
# Full module forward
# ---------------------------------------------------------------------------
def multi_head_attention_forward(x_nct, c_nct, params, n_heads):
    """x: (B, channels, T_t); c: (B, channels, T_s) -> (B, out_channels, T_t)."""
    B, C, T_t = x_nct.shape
    T_s = c_nct.shape[2]
    dk = C // n_heads
    c_out = params["wo"].shape[0]

    p = prepare_params(params, n_heads)

    cap, vmem_limit = _hw_budget()
    tq, tk = _flash_tiles(T_t, T_s, B, n_heads, dk, c_out, cap, vmem_limit)
    tt_pad = _round_up(T_t, tq)
    ts_pad = _round_up(T_s, tk)

    # Only XLA-level layout work: NCT -> time-major, bf16 cast, tail padding.
    x_btc = jnp.transpose(x_nct, (0, 2, 1)).astype(jnp.bfloat16)
    c_btc = jnp.transpose(c_nct, (0, 2, 1)).astype(jnp.bfloat16)
    if tt_pad != T_t:
        x_btc = jnp.pad(x_btc, ((0, 0), (0, tt_pad - T_t), (0, 0)))
    if ts_pad != T_s:
        c_btc = jnp.pad(c_btc, ((0, 0), (0, ts_pad - T_s), (0, 0)))

    q = head_proj(x_btc, p["wq_h"], p["bq_h"], tq, vmem_limit)      # (B, H, Ttp, dk)
    kv = head_proj(c_btc, p["wkv_h"], p["bkv_h"], tk, vmem_limit)   # (B, 2H, Tsp, dk)

    out = flash_mha_outproj(q, kv, p["wo_h"], p["bo"], ts_valid=T_s, tq=tq,
                            tk=tk, vmem_limit=vmem_limit, out_dtype=x_nct.dtype)
    return out[:, :, :T_t] if tt_pad != T_t else out


# ---------------------------------------------------------------------------
# Deterministic parameter init (mirrors the module's __init__)
# ---------------------------------------------------------------------------
def init_params(key, channels, out_channels):
    keys = jax.random.split(key, 8)

    def xavier(k, fan_out, fan_in):
        bound = math.sqrt(6.0 / (fan_in + fan_out))
        return jax.random.uniform(k, (fan_out, fan_in), jnp.float32, -bound, bound)

    def bias_init(k, fan_out, fan_in):
        bound = 1.0 / math.sqrt(fan_in)
        return jax.random.uniform(k, (fan_out,), jnp.float32, -bound, bound)

    return {
        "wq": xavier(keys[0], channels, channels),
        "bq": bias_init(keys[1], channels, channels),
        "wk": xavier(keys[2], channels, channels),
        "bk": bias_init(keys[3], channels, channels),
        "wv": xavier(keys[4], channels, channels),
        "bv": bias_init(keys[5], channels, channels),
        "wo": xavier(keys[6], out_channels, channels),
        "bo": bias_init(keys[7], out_channels, channels),
    }


# ---------------------------------------------------------------------------
# Pure-JAX reference (mirrors the PyTorch forward) for a sanity check
# ---------------------------------------------------------------------------
def _reference_forward(x_nct, c_nct, params, n_heads):
    B, C, T_t = x_nct.shape
    dk = C // n_heads

    def conv(a, w, b):  # 1x1 Conv1d on NCT
        return jnp.einsum("oc,bct->bot", w, a) + b[None, :, None]

    q = conv(x_nct, params["wq"], params["bq"])
    k = conv(c_nct, params["wk"], params["bk"])
    v = conv(c_nct, params["wv"], params["bv"])

    def heads(a):  # (B, C, T) -> (B, H, T, dk)  (matches view + transpose(2,3))
        Bh, Ch, Th = a.shape
        return a.reshape(Bh, n_heads, dk, Th).transpose(0, 1, 3, 2)

    qh, kh, vh = heads(q), heads(k), heads(v)
    scores = jnp.einsum("bhtd,bhsd->bhts", qh / math.sqrt(dk), kh)
    p_attn = jax.nn.softmax(scores, axis=-1)
    o = jnp.einsum("bhts,bhsd->bhtd", p_attn, vh)
    o = o.transpose(0, 1, 3, 2).reshape(B, C, T_t)
    return conv(o, params["wo"], params["bo"])


if __name__ == "__main__":
    # TODO(synk): window_size (relative-position embeddings), proximal_bias,
    # block_length, attn_mask, dropout, and the `self.attn` probability side
    # output (all disabled / None in the default forward) are not implemented.
    B, channels, out_channels, n_heads = 2, 32, 32, 4
    T_t, T_s = 16, 24   # cross-attention with ragged lengths (exercises masking)

    key = jax.random.PRNGKey(0)
    kx, kc, kp = jax.random.split(key, 3)
    x = jax.random.normal(kx, (B, channels, T_t), jnp.float32)   # (B, C, T_t) NCT
    c = jax.random.normal(kc, (B, channels, T_s), jnp.float32)   # (B, C, T_s) NCT
    params = init_params(kp, channels, out_channels)

    out = multi_head_attention_forward(x, c, params, n_heads)
    out = jax.block_until_ready(out)
    assert out.shape == (B, out_channels, T_t), out.shape

    ref = jax.block_until_ready(_reference_forward(x, c, params, n_heads))
    max_err = float(jnp.max(jnp.abs(out - ref)))
    # bf16 matmul operands + approx reciprocal -> tolerance scaled to output range
    tol = 5e-2 * max(1.0, float(jnp.max(jnp.abs(ref))))
    assert max_err < tol, f"max abs err vs reference: {max_err} (tol {tol})"

    print("KERNEL_OK")
</pallas_src>

<mosaic_0001>
module attributes {stable_mosaic.version = 11 : i64} {
  func.func @_head_proj_kernel(%arg0: i32, %arg1: i32, %arg2: i32, %arg3: memref<1x128x32xbf16, #tpu.memory_space<vmem>>, %arg4: memref<1x32x8xbf16, #tpu.memory_space<vmem>>, %arg5: memref<1x1x8xf32, #tpu.memory_space<vmem>>, %arg6: memref<1x1x128x8xbf16, #tpu.memory_space<vmem>>) attributes {dimension_semantics = [#tpu.dimension_semantics<parallel>, #tpu.dimension_semantics<parallel>, #tpu.dimension_semantics<parallel>], iteration_bounds = array<i64: 2, 1, 4>, scalar_prefetch = 0 : i64, scratch_operands = 0 : i64, tpu.core_type = #tpu.core_type<tc>, window_params = [{transform_indices = @transform_0, window_bounds = array<i64: 1, 128, 32>}, {transform_indices = @transform_1, window_bounds = array<i64: 1, 32, 8>}, {transform_indices = @transform_2, window_bounds = array<i64: 1, 1, 8>}, {transform_indices = @transform_3, window_bounds = array<i64: 1, 1, 128, 8>}]} {
    %c0 = arith.constant 0 : index
    %c0_0 = arith.constant 0 : index
    %c0_1 = arith.constant 0 : index
    %0 = vector.load %arg3[%c0, %c0_0, %c0_1] : memref<1x128x32xbf16, #tpu.memory_space<vmem>>, vector<1x128x32xbf16>
    %1 = vector.shape_cast %0 : vector<1x128x32xbf16> to vector<128x32xbf16>
    %c0_2 = arith.constant 0 : index
    %c0_3 = arith.constant 0 : index
    %c0_4 = arith.constant 0 : index
    %2 = vector.load %arg4[%c0_2, %c0_3, %c0_4] : memref<1x32x8xbf16, #tpu.memory_space<vmem>>, vector<1x32x8xbf16>
    %3 = vector.shape_cast %2 : vector<1x32x8xbf16> to vector<32x8xbf16>
    %cst = arith.constant dense<0.000000e+00> : vector<128x8xf32>
    %4 = tpu.matmul %1, %3, %cst {dimension_numbers = #tpu.dot_dimension_numbers<[1], [0], [0], [1], [0, 0, 1, 1], [], []>} : vector<128x32xbf16>, vector<32x8xbf16>, vector<128x8xf32> -> vector<128x8xf32>
    %c0_5 = arith.constant 0 : index
    %c0_6 = arith.constant 0 : index
    %c0_7 = arith.constant 0 : index
    %5 = vector.load %arg5[%c0_5, %c0_6, %c0_7] : memref<1x1x8xf32, #tpu.memory_space<vmem>>, vector<1x1x8xf32>
    %6 = vector.shape_cast %5 : vector<1x1x8xf32> to vector<1x8xf32>
    %7 = vector.broadcast %6 : vector<1x8xf32> to vector<128x8xf32>
    %8 = arith.addf %4, %7 : vector<128x8xf32>
    %9 = arith.truncf %8 : vector<128x8xf32> to vector<128x8xbf16>
    %c0_8 = arith.constant 0 : index
    %c0_9 = arith.constant 0 : index
    %c0_10 = arith.constant 0 : index
    %c0_11 = arith.constant 0 : index
    %10 = vector.load %arg6[%c0_8, %c0_9, %c0_10, %c0_11] : memref<1x1x128x8xbf16, #tpu.memory_space<vmem>>, vector<1x1x128x8xbf16>
    %11 = vector.shape_cast %10 : vector<1x1x128x8xbf16> to vector<128x8xbf16>
    %12 = vector.shape_cast %9 : vector<128x8xbf16> to vector<1x1x128x8xbf16>
    tpu.vector_store %arg6[%c0_8, %c0_9, %c0_10, %c0_11], %12 {strides = array<i32>} : memref<1x1x128x8xbf16, #tpu.memory_space<vmem>>, vector<1x1x128x8xbf16>,
    return
  }
  func.func @transform_0(%arg0: i32, %arg1: i32, %arg2: i32) -> (i32, i32, i32) {
    %c0_i32 = arith.constant 0 : i32
    %c0_i32_0 = arith.constant 0 : i32
    return %arg0, %arg1, %c0_i32 : i32, i32, i32
  }
  func.func @transform_1(%arg0: i32, %arg1: i32, %arg2: i32) -> (i32, i32, i32) {
    %c0_i32 = arith.constant 0 : i32
    %c0_i32_0 = arith.constant 0 : i32
    %c0_i32_1 = arith.constant 0 : i32
    return %arg2, %c0_i32, %c0_i32_0 : i32, i32, i32
  }
  func.func @transform_2(%arg0: i32, %arg1: i32, %arg2: i32) -> (i32, i32, i32) {
    %c0_i32 = arith.constant 0 : i32
    %c0_i32_0 = arith.constant 0 : i32
    %c0_i32_1 = arith.constant 0 : i32
    return %arg2, %c0_i32, %c0_i32_0 : i32, i32, i32
  }
  func.func @transform_3(%arg0: i32, %arg1: i32, %arg2: i32) -> (i32, i32, i32, i32) {
    %c0_i32 = arith.constant 0 : i32
    %c0_i32_0 = arith.constant 0 : i32
    return %arg0, %arg2, %arg1, %c0_i32 : i32, i32, i32, i32
  }
}

</mosaic_0001>

<bundles_post_ra>
// kernel: tpu_custom_call.1
= control target key start
LH: loop header
LB: loop body
LE: loop exit
PB: predicated region body
PF: predicated region fallthrough
CT: control target
= control target key end

     0   :  { %s885_s12 = smov 0   ;;  %s887_s13 = smov 0   ;;  %s991_s0 = inlined_call_operand.vmem [shape: bf16[2,128,32], index: 0, kind: input, shape index: {}]   ;;  %s992_s1 = inlined_call_operand.vmem [shape: bf16[4,32,8], index: 1, kind: input, shape index: {}]   ;;  %s993_s2 = inlined_call_operand.vmem [shape: f32[4,1,8], index: 2, kind: input, shape index: {}]   ;;  %s994_s3 = inlined_call_operand.vmem [shape: bf16[2,4,128,8], index: 3, kind: output, shape index: {}]  }
   0x1   :  { %s889_s14 = smov 0   ;;  %s891_s15 = smov 0  }
   0x2   :  { %s893_s16 = smov 0  }
   0x3 LB: > { %s25_s17 = sadd.s32 1, %s855_s14  ;;  %s32_s18 = sadd.s32 1, %s859_s15  ;;  %s863_s16 = sphi %s893_s16, %s13_s16   ;;  %s859_s15 = sphi %s891_s15, %s998_s15   ;;  %s855_s14 = sphi %s889_s14, %s997_s14   ;;  %s851_s13 = sphi %s887_s13, %s996_s13   ;;  %s847_s12 = sphi %s885_s12, %s995_s12  }
   0x4   : > { %p26_p0 = scmp.ge.s32.totalorder %s25_s17, 4  ;;  %p678_p1 = scmp.ge.s32.totalorder %s863_s16, 1 }
   0x5   : > { %p185_p2 = scmp.lt.s32.totalorder %s863_s16, 9 }
   0x6   : > { %s1000_s17 = smov (%p26_p0, %s25_s17), 0  ;;  %s1002_s18 = smov (!%p26_p0, %s32_s18), %s859_s15 }
   0x7   : > { %p186_p3 = pnand %p678_p1, %p185_p2  ;;  %p34_p4 = scmp.ge.s32.totalorder %s1002_s18, 2 }
   0x8   : > { %p230_p5 = scmp.lt.s32.totalorder (!%p186_p3), %s851_s13, 1  ;;  %p239_p6 = scmp.lt.s32.totalorder (!%p186_p3), %s847_s12, 3  ;;  %vm341_vm0 = vcmask (!%p186_p3), 261120   ;;  %vm527_vm1 = vcmask (!%p186_p3), 60416  }
   0x9   : > { %s1004_s18 = smov (%p34_p4, %s1002_s18), 0  ;;  %189 = sbr.rel (%p186_p3) target bundleno = 257 (0x101), region = 32 }
  0x10   : > { %s1006_s13 = smov (!%p230_p5, %s851_s13), 1  ;;  %s1008_s12 = smov (!%p239_p6, %s847_s12), 3 }
  0x11   : > { %s723_s19 = sshll.u32 %s1006_s13, 6  ;;  %s724_s23 = sshll.u32 %s1008_s12, 4 }
  0x12   : > { %s237_s22 = scalar_lea.vmem %s991_s0, %s723_s19  ;;  %s243_s26 = scalar_lea.vmem %s992_s1, %s724_s23 }
  0x13   : > { %v817_v0 = vld [vmem:[%s237_s22] sm:$0xff]   ;;  %s924_s27 = sadd.s32 %s724_s23, %s723_s19  ;;  %v816_v2 = vld [vmem:[%s243_s26 + $0x8] sm:$0xff]   ;;  %v821_v6 = vld [vmem:[%s237_s22 + $0x10] sm:$0xff]   ;;  %s246_s30 = scalar_lea.vmem %s993_s2, %s1008_s12 }
  0x14   : > { %v815_v1 = vld [vmem:[%s243_s26] sm:$0xff]   ;;  %755 = vmatprep.mubr.msk.bf16.mxu0 %vm341_vm0, %v817_v0  ;;  %v819_v4 = vld [vmem:[%s237_s22 + $0x8] sm:$0xff]   ;;  %v822_v7 = vld [vmem:[%s237_s22 + $0x30] sm:$0xff]   ;;  %s685_s4 = sshll.u32 %s924_s27, 2 }
  0x15   : > { %751 = vmatprep.subr.bf16.mxu0 %v815_v1  ;;  %771 = vmatprep.subr.bf16.mxu1 %v815_v1  ;;  %v818_v3 = vld [vmem:[%s237_s22 + $0x20] sm:$0xff]   ;;  %v820_v5 = vld [vmem:[%s237_s22 + $0x28] sm:$0xff]   ;;  %v823_v8 = vld [vmem:[%s237_s22 + $0x18] sm:$0xff]   ;;  %s942_s7 = scalar_lea.vmem %s994_s3, %s685_s4 }
  0x16   : > { %752 = vmatpush3.bf16.msra.mxu0 %v815_v1  ;;  %773 = vmatpush3.bf16.msra.mxu1 %v815_v1  ;;  %v824_v9 = vld [vmem:[%s237_s22 + $0x38] sm:$0xff]   ;;  %v686_v10 = vld [vmem:[%s246_s30] ss:$0 sm:$0xff] }
  0x17   : > { %753 = vmatprep.subr.bf16.mxu0 %v816_v2  ;;  %772 = vmatprep.subr.bf16.mxu1 %v816_v2 }
  0x18   : > { %763 = vmatprep.mubr.msk.bf16.mxu1 %vm341_vm0, %v818_v3 }
  0x1a   : > { %754 = vmatpush3.bf16.msra.mxu0 %v816_v2  ;;  %774 = vmatpush3.bf16.msra.mxu1 %v816_v2 }
  0x1d   : > { %756 = vmatmul.mubr.msk.bf16.vlgmr.msra.gmra.mrb[0].mxu0 %vm341_vm0, %v819_v4  ;;  %764 = vmatmul.mubr.msk.bf16.vlgmr.msra.gmra.mrb[0].mxu1 %vm341_vm0, %v820_v5 }
  0x1e   : > { %759 = vmatprep.mubr.msk.bf16.mxu0 %vm341_vm0, %v821_v6  ;;  %767 = vmatprep.mubr.msk.bf16.mxu1 %vm341_vm0, %v822_v7 }
  0x25   : > { %760 = vmatmul.mubr.msk.bf16.gmra.mrb[4].mxu0 %vm341_vm0, %v823_v8  ;;  %768 = vmatmul.mubr.msk.bf16.gmra.mrb[4].mxu1 %vm341_vm0, %v824_v9 }
  0xf0   : > { %v757_v11 = vpop.f32.mrb[0].mxu0  ;;  %v765_v12 = vpop.f32.mrb[0].mxu1 }
  0xf1   : > { %v409_v13 = vadd.f32 %v757_v11, %v686_v10  ;;  %v441_v14 = vadd.f32 %v765_v12, %v686_v10  ;;  %v400_v15 = vpop.f32.mrb[1].mxu0  ;;  %v432_v16 = vpop.f32.mrb[1].mxu1 }
  0xf2   : > { %v401_v17 = vadd.f32 %v686_v10, %v400_v15  ;;  %v433_v18 = vadd.f32 %v686_v10, %v432_v16  ;;  %v758_v19 = vpop.f32.mrb[2].mxu0  ;;  %v766_v20 = vpop.f32.mrb[2].mxu1 }
  0xf3   : > { %v727_v21 = vpack.c.bf16 %v409_v13, %v409_v13  ;;  %v735_v22 = vpack.c.bf16 %v441_v14, %v441_v14  ;;  %v412_v23 = vadd.f32 %v758_v19, %v686_v10  ;;  %v444_v24 = vadd.f32 %v766_v20, %v686_v10  ;;  %v403_v25 = vpop.f32.mrb[3].mxu0  ;;  %v435_v26 = vpop.f32.mrb[3].mxu1 }
  0xf4   : > { %v725_v27 = vpack.c.bf16 %v401_v17, %v401_v17  ;;  %v733_v28 = vpack.c.bf16 %v433_v18, %v433_v18  ;;  %v404_v29 = vadd.f32 %v686_v10, %v403_v25  ;;  %v436_v30 = vadd.f32 %v686_v10, %v435_v26 }
  0xf5   : > { %530 = vst.msk [vmem:[%s942_s7 + $0x8] sm:$0xf] %vm527_vm1, %v727_v21  ;;  %538 = vst.msk [vmem:[%s942_s7 + $0x28] sm:$0xf] %vm527_vm1, %v735_v22  ;;  %v728_v31 = vpack.c.bf16 %v412_v23, %v412_v23  ;;  %v736_v32 = vpack.c.bf16 %v444_v24, %v444_v24 }
  0xf6   : > { %528 = vst.msk [vmem:[%s942_s7] sm:$0xf] %vm527_vm1, %v725_v27  ;;  %536 = vst.msk [vmem:[%s942_s7 + $0x20] sm:$0xf] %vm527_vm1, %v733_v28  ;;  %v726_v33 = vpack.c.bf16 %v404_v29, %v404_v29  ;;  %v734_v34 = vpack.c.bf16 %v436_v30, %v436_v30 }
  0xf7   : > { %531 = vst.msk [vmem:[%s942_s7 + $0xc] sm:$0xf] %vm527_vm1, %v728_v31  ;;  %539 = vst.msk [vmem:[%s942_s7 + $0x2c] sm:$0xf] %vm527_vm1, %v736_v32 }
  0xf8   : > { %529 = vst.msk [vmem:[%s942_s7 + $0x4] sm:$0xf] %vm527_vm1, %v726_v33  ;;  %537 = vst.msk [vmem:[%s942_s7 + $0x24] sm:$0xf] %vm527_vm1, %v734_v34  ;;  %v761_v35 = vpop.f32.mrb[4].mxu0  ;;  %v769_v36 = vpop.f32.mrb[4].mxu1 }
  0xf9   : > { %v425_v37 = vadd.f32 %v761_v35, %v686_v10  ;;  %v457_v38 = vadd.f32 %v769_v36, %v686_v10  ;;  %v416_v39 = vpop.f32.mrb[5].mxu0  ;;  %v448_v40 = vpop.f32.mrb[5].mxu1 }
  0xfa   : > { %v417_v41 = vadd.f32 %v686_v10, %v416_v39  ;;  %v449_v42 = vadd.f32 %v686_v10, %v448_v40  ;;  %v762_v43 = vpop.f32.mrb[6].mxu0  ;;  %v770_v44 = vpop.f32.mrb[6].mxu1 }
  0xfb   : > { %v731_v45 = vpack.c.bf16 %v425_v37, %v425_v37  ;;  %v739_v46 = vpack.c.bf16 %v457_v38, %v457_v38  ;;  %v428_v47 = vadd.f32 %v762_v43, %v686_v10  ;;  %v460_v48 = vadd.f32 %v770_v44, %v686_v10  ;;  %v419_v49 = vpop.f32.mrb[7].mxu0  ;;  %v451_v50 = vpop.f32.mrb[7].mxu1 }
  0xfc   : > { %v729_v51 = vpack.c.bf16 %v417_v41, %v417_v41  ;;  %v737_v52 = vpack.c.bf16 %v449_v42, %v449_v42  ;;  %v420_v53 = vadd.f32 %v686_v10, %v419_v49  ;;  %v452_v54 = vadd.f32 %v686_v10, %v451_v50 }
  0xfd   : > { %534 = vst.msk [vmem:[%s942_s7 + $0x18] sm:$0xf] %vm527_vm1, %v731_v45  ;;  %542 = vst.msk [vmem:[%s942_s7 + $0x38] sm:$0xf] %vm527_vm1, %v739_v46  ;;  %v732_v55 = vpack.c.bf16 %v428_v47, %v428_v47  ;;  %v740_v56 = vpack.c.bf16 %v460_v48, %v460_v48 }
  0xfe   : > { %532 = vst.msk [vmem:[%s942_s7 + $0x10] sm:$0xf] %vm527_vm1, %v729_v51  ;;  %540 = vst.msk [vmem:[%s942_s7 + $0x30] sm:$0xf] %vm527_vm1, %v737_v52  ;;  %v730_v57 = vpack.c.bf16 %v420_v53, %v420_v53  ;;  %v738_v58 = vpack.c.bf16 %v452_v54, %v452_v54 }
  0xff   : > { %535 = vst.msk [vmem:[%s942_s7 + $0x1c] sm:$0xf] %vm527_vm1, %v732_v55  ;;  %543 = vst.msk [vmem:[%s942_s7 + $0x3c] sm:$0xf] %vm527_vm1, %v740_v56 }
 0x100   : > { %533 = vst.msk [vmem:[%s942_s7 + $0x14] sm:$0xf] %vm527_vm1, %v730_v57  ;;  %541 = vst.msk [vmem:[%s942_s7 + $0x34] sm:$0xf] %vm527_vm1, %v738_v58 }
 0x101 PF: > { %s13_s16 = sadd.s32 1, %s863_s16   ;;  %s995_s12 = smov %s855_s14 }
 0x102   : > { %p10_p7 = scmp.ge.s32.totalorder %s13_s16, 10   ;;  %s996_s13 = smov %s859_s15 }
 0x103   : > { %s997_s14 = smov %s1000_s17  ;;  %s998_s15 = smov %s1004_s18 }
 0x104   :  { %12 = sbr.rel (!%p10_p7) target bundleno = 3 (0x3), region = 68 }

</bundles_post_ra>
